<compile_context>
chip_gen: v6e
topology: v6e:2x2x1
jax: 0.10.0
libtpu: 0.0.40
codegen_flags: <defaults>
</compile_context>

<pallas_src>
import functools

import jax
import jax.numpy as jnp
from jax.experimental import pallas as pl
from jax.experimental.pallas import tpu as pltpu


def _fused_bn_add_conv_kernel(x_ref, r_ref, gamma_ref, beta_ref, mean_ref,
                              var_ref, w_ref, o_ref, *, eps):
    # x_ref, r_ref : (Cin, t)   channels on sublanes, HW on lanes
    # gamma/beta/mean/var : (Cin, 1) resident BN params
    # w_ref        : (Cout, Cin) 1x1-conv weight (resident)
    # o_ref        : (Cout, t)   lane-dense output tile
    scale = gamma_ref[...] * jax.lax.rsqrt(var_ref[...] + eps)   # (Cin, 1), EUP
    bias = beta_ref[...] - mean_ref[...] * scale                 # (Cin, 1)
    y = x_ref[...] * scale + bias + r_ref[...]                   # (Cin, t), VPU
    o_ref[...] = jnp.dot(
        w_ref[...], y, preferred_element_type=jnp.float32
    ).astype(o_ref.dtype)


def _round_up(v, m):
    return ((v + m - 1) // m) * m


def _pick_hw_tile(HW, N, t_hw):
    """Pick an HW tile that is a multiple of 128 or the full HW extent, and
    guarantee >=2 grid programs when possible (v7x megacore)."""
    if HW <= 128:
        return HW                       # full-extent block, always legal
    t = min(t_hw, HW)
    if t < HW:
        t = max((t // 128) * 128, 128)  # lane-dense multiple of 128
    # Megacore: if the whole problem lands in one program, split the HW axis.
    if N * ((HW + t - 1) // t) < 2:
        t_split = _round_up((HW + 1) // 2, 128)
        if t_split < HW:
            t = t_split
    return t


@functools.partial(jax.jit, static_argnames=("eps", "t_hw"))
def bn_add_conv1x1(x85, x72, gamma, beta, running_mean, running_var, conv_w,
                   eps=1e-5, t_hw=2048):
    """x85, x72: (N, Cin, H, W) float32.  conv_w: (Cout, Cin, 1, 1)."""
    N, Cin, H, W = x85.shape
    Cout = conv_w.shape[0]
    HW = H * W

    # NCHW -> (N, Cin, H*W): contiguous trailing dims, no data movement.
    x3 = x85.reshape(N, Cin, HW)
    r3 = x72.reshape(N, Cin, HW)
    w_mat = conv_w.reshape(Cout, Cin)
    g2 = gamma.reshape(Cin, 1)
    b2 = beta.reshape(Cin, 1)
    m2 = running_mean.reshape(Cin, 1)
    v2 = running_var.reshape(Cin, 1)

    t = _pick_hw_tile(HW, N, t_hw)
    grid = (N, pl.cdiv(HW, t))

    kernel = functools.partial(_fused_bn_add_conv_kernel, eps=eps)

    cost = pl.CostEstimate(
        flops=2 * N * Cout * Cin * HW,
        transcendentals=N * grid[1] * Cin,
        bytes_accessed=4 * N * HW * (2 * Cin + Cout),
    )

    out3 = pl.pallas_call(
        kernel,
        out_shape=jax.ShapeDtypeStruct((N, Cout, HW), x85.dtype),
        grid_spec=pltpu.PrefetchScalarGridSpec(
            num_scalar_prefetch=0,
            grid=grid,
            in_specs=[
                pl.BlockSpec((None, Cin, t), lambda n, j: (n, 0, j)),
                pl.BlockSpec((None, Cin, t), lambda n, j: (n, 0, j)),
                pl.BlockSpec((Cin, 1), lambda n, j: (0, 0)),
                pl.BlockSpec((Cin, 1), lambda n, j: (0, 0)),
                pl.BlockSpec((Cin, 1), lambda n, j: (0, 0)),
                pl.BlockSpec((Cin, 1), lambda n, j: (0, 0)),
                pl.BlockSpec((Cout, Cin), lambda n, j: (0, 0)),
            ],
            out_specs=pl.BlockSpec((None, Cout, t), lambda n, j: (n, 0, j)),
        ),
        compiler_params=pltpu.CompilerParams(
            dimension_semantics=("parallel", "parallel"),
        ),
        cost_estimate=cost,
    )(x3, r3, g2, b2, m2, v2, w_mat)

    # (N, Cout, H*W) -> NCHW: free reshape.
    return out3.reshape(N, Cout, H, W)


def _reference(x85, x72, gamma, beta, running_mean, running_var, conv_w, eps=1e-5):
    scale = gamma / jnp.sqrt(running_var + eps)
    bias = beta - running_mean * scale
    y = x85 * scale[None, :, None, None] + bias[None, :, None, None] + x72
    return jnp.einsum("nchw,oc->nohw", y, conv_w.reshape(conv_w.shape[0], -1))


def _make_params(key, Cin, Cout):
    k3, k4, k5, k6, k7 = jax.random.split(key, 5)
    gamma = 1.0 + 0.1 * jax.random.normal(k3, (Cin,), dtype=jnp.float32)
    beta = 0.1 * jax.random.normal(k4, (Cin,), dtype=jnp.float32)
    running_mean = 0.05 * jax.random.normal(k5, (Cin,), dtype=jnp.float32)
    running_var = 1.0 + 0.1 * jax.nn.softplus(
        jax.random.normal(k6, (Cin,), dtype=jnp.float32))
    conv_w = (jax.random.normal(k7, (Cout, Cin, 1, 1), dtype=jnp.float32)
              / jnp.sqrt(Cin))
    return gamma, beta, running_mean, running_var, conv_w


if __name__ == "__main__":
    key = jax.random.PRNGKey(0)
    kx, kr, kp, kx2, kr2 = jax.random.split(key, 5)

    # Channels fixed by the layers (Cin=32, Cout=192); small spatial test case.
    Cin, Cout = 32, 192
    gamma, beta, running_mean, running_var, conv_w = _make_params(kp, Cin, Cout)

    # Case 1: small shape (batch=2, spatial=16) — HW multiple of 128,
    # exercises the megacore >=2-programs split.
    N, H, W = 2, 16, 16
    x85 = jax.random.normal(kx, (N, Cin, H, W), dtype=jnp.float32)
    x72 = jax.random.normal(kr, (N, Cin, H, W), dtype=jnp.float32)
    out = jax.block_until_ready(
        bn_add_conv1x1(x85, x72, gamma, beta, running_mean, running_var, conv_w))
    ref = _reference(x85, x72, gamma, beta, running_mean, running_var, conv_w)
    assert out.shape == (N, Cout, H, W), out.shape
    assert jnp.allclose(out, ref, atol=1e-4, rtol=1e-4), float(
        jnp.max(jnp.abs(out - ref)))

    # Case 2: the module's actual shape (1, 32, 56, 56) — HW=3136 is not a
    # multiple of 128, exercising the masked partial boundary block.
    N2, H2, W2 = 1, 56, 56
    x85b = jax.random.normal(kx2, (N2, Cin, H2, W2), dtype=jnp.float32)
    x72b = jax.random.normal(kr2, (N2, Cin, H2, W2), dtype=jnp.float32)
    out2 = jax.block_until_ready(
        bn_add_conv1x1(x85b, x72b, gamma, beta, running_mean, running_var, conv_w))
    ref2 = _reference(x85b, x72b, gamma, beta, running_mean, running_var, conv_w)
    assert out2.shape == (N2, Cout, H2, W2), out2.shape
    assert jnp.allclose(out2, ref2, atol=1e-4, rtol=1e-4), float(
        jnp.max(jnp.abs(out2 - ref2)))

    print("KERNEL_OK")
</pallas_src>

<mosaic_0001>
module attributes {stable_mosaic.version = 11 : i64} {
  func.func @_fused_bn_add_conv_kernel(%arg0: i32, %arg1: i32, %arg2: memref<1x32x256xf32, #tpu.memory_space<vmem>>, %arg3: memref<1x32x256xf32, #tpu.memory_space<vmem>>, %arg4: memref<32x1xf32, #tpu.memory_space<vmem>>, %arg5: memref<32x1xf32, #tpu.memory_space<vmem>>, %arg6: memref<32x1xf32, #tpu.memory_space<vmem>>, %arg7: memref<32x1xf32, #tpu.memory_space<vmem>>, %arg8: memref<192x32xf32, #tpu.memory_space<vmem>>, %arg9: memref<1x192x256xf32, #tpu.memory_space<vmem>>) attributes {dimension_semantics = [#tpu.dimension_semantics<parallel>, #tpu.dimension_semantics<parallel>], iteration_bounds = array<i64: 2, 1>, scalar_prefetch = 0 : i64, scratch_operands = 0 : i64, tpu.core_type = #tpu.core_type<tc>, window_params = [{transform_indices = @transform_0, window_bounds = array<i64: 1, 32, 256>}, {transform_indices = @transform_1, window_bounds = array<i64: 1, 32, 256>}, {pipeline_mode = #tpu.pipeline_mode<synchronous>, transform_indices = @transform_2, window_bounds = array<i64: 32, 1>}, {pipeline_mode = #tpu.pipeline_mode<synchronous>, transform_indices = @transform_3, window_bounds = array<i64: 32, 1>}, {pipeline_mode = #tpu.pipeline_mode<synchronous>, transform_indices = @transform_4, window_bounds = array<i64: 32, 1>}, {pipeline_mode = #tpu.pipeline_mode<synchronous>, transform_indices = @transform_5, window_bounds = array<i64: 32, 1>}, {pipeline_mode = #tpu.pipeline_mode<synchronous>, transform_indices = @transform_6, window_bounds = array<i64: 192, 32>}, {transform_indices = @transform_7, window_bounds = array<i64: 1, 192, 256>}]} {
    %c0 = arith.constant 0 : index
    %c0_0 = arith.constant 0 : index
    %0 = vector.load %arg4[%c0, %c0_0] : memref<32x1xf32, #tpu.memory_space<vmem>>, vector<32x1xf32>
    %c0_1 = arith.constant 0 : index
    %c0_2 = arith.constant 0 : index
    %1 = vector.load %arg7[%c0_1, %c0_2] : memref<32x1xf32, #tpu.memory_space<vmem>>, vector<32x1xf32>
    %cst = arith.constant 9.99999974E-6 : f32
    %2 = vector.broadcast %cst : f32 to vector<32x1xf32>
    %3 = arith.addf %1, %2 : vector<32x1xf32>
    %4 = math.rsqrt %3 : vector<32x1xf32>
    %5 = arith.mulf %0, %4 : vector<32x1xf32>
    %c0_3 = arith.constant 0 : index
    %c0_4 = arith.constant 0 : index
    %6 = vector.load %arg5[%c0_3, %c0_4] : memref<32x1xf32, #tpu.memory_space<vmem>>, vector<32x1xf32>
    %c0_5 = arith.constant 0 : index
    %c0_6 = arith.constant 0 : index
    %7 = vector.load %arg6[%c0_5, %c0_6] : memref<32x1xf32, #tpu.memory_space<vmem>>, vector<32x1xf32>
    %8 = arith.mulf %7, %5 : vector<32x1xf32>
    %9 = arith.subf %6, %8 : vector<32x1xf32>
    %c0_7 = arith.constant 0 : index
    %c0_8 = arith.constant 0 : index
    %c0_9 = arith.constant 0 : index
    %10 = vector.load %arg2[%c0_7, %c0_8, %c0_9] : memref<1x32x256xf32, #tpu.memory_space<vmem>>, vector<1x32x256xf32>
    %11 = vector.shape_cast %10 : vector<1x32x256xf32> to vector<32x256xf32>
    %12 = vector.broadcast %5 : vector<32x1xf32> to vector<32x256xf32>
    %13 = arith.mulf %11, %12 : vector<32x256xf32>
    %14 = vector.broadcast %9 : vector<32x1xf32> to vector<32x256xf32>
    %15 = arith.addf %13, %14 : vector<32x256xf32>
    %c0_10 = arith.constant 0 : index
    %c0_11 = arith.constant 0 : index
    %c0_12 = arith.constant 0 : index
    %16 = vector.load %arg3[%c0_10, %c0_11, %c0_12] : memref<1x32x256xf32, #tpu.memory_space<vmem>>, vector<1x32x256xf32>
    %17 = vector.shape_cast %16 : vector<1x32x256xf32> to vector<32x256xf32>
    %18 = arith.addf %15, %17 : vector<32x256xf32>
    %c0_13 = arith.constant 0 : index
    %c0_14 = arith.constant 0 : index
    %19 = vector.load %arg8[%c0_13, %c0_14] : memref<192x32xf32, #tpu.memory_space<vmem>>, vector<192x32xf32>
    %cst_15 = arith.constant dense<0.000000e+00> : vector<192x256xf32>
    %20 = tpu.matmul %19, %18, %cst_15 {dimension_numbers = #tpu.dot_dimension_numbers<[1], [0], [0], [1], [0, 0, 1, 1], [], []>} : vector<192x32xf32>, vector<32x256xf32>, vector<192x256xf32> -> vector<192x256xf32>
    %c0_16 = arith.constant 0 : index
    %c0_17 = arith.constant 0 : index
    %c0_18 = arith.constant 0 : index
    %21 = vector.load %arg9[%c0_16, %c0_17, %c0_18] : memref<1x192x256xf32, #tpu.memory_space<vmem>>, vector<1x192x256xf32>
    %22 = vector.shape_cast %21 : vector<1x192x256xf32> to vector<192x256xf32>
    %23 = vector.shape_cast %20 : vector<192x256xf32> to vector<1x192x256xf32>
    tpu.vector_store %arg9[%c0_16, %c0_17, %c0_18], %23 {strides = array<i32>} : memref<1x192x256xf32, #tpu.memory_space<vmem>>, vector<1x192x256xf32>,
    return
  }
  func.func @transform_0(%arg0: i32, %arg1: i32) -> (i32, i32, i32) {
    %c0_i32 = arith.constant 0 : i32
    %c0_i32_0 = arith.constant 0 : i32
    return %arg0, %c0_i32, %arg1 : i32, i32, i32
  }
  func.func @transform_1(%arg0: i32, %arg1: i32) -> (i32, i32, i32) {
    %c0_i32 = arith.constant 0 : i32
    %c0_i32_0 = arith.constant 0 : i32
    return %arg0, %c0_i32, %arg1 : i32, i32, i32
  }
  func.func @transform_2(%arg0: i32, %arg1: i32) -> (i32, i32) {
    %c0_i32 = arith.constant 0 : i32
    %c0_i32_0 = arith.constant 0 : i32
    %c0_i32_1 = arith.constant 0 : i32
    return %c0_i32, %c0_i32_0 : i32, i32
  }
  func.func @transform_3(%arg0: i32, %arg1: i32) -> (i32, i32) {
    %c0_i32 = arith.constant 0 : i32
    %c0_i32_0 = arith.constant 0 : i32
    %c0_i32_1 = arith.constant 0 : i32
    return %c0_i32, %c0_i32_0 : i32, i32
  }
  func.func @transform_4(%arg0: i32, %arg1: i32) -> (i32, i32) {
    %c0_i32 = arith.constant 0 : i32
    %c0_i32_0 = arith.constant 0 : i32
    %c0_i32_1 = arith.constant 0 : i32
    return %c0_i32, %c0_i32_0 : i32, i32
  }
  func.func @transform_5(%arg0: i32, %arg1: i32) -> (i32, i32) {
    %c0_i32 = arith.constant 0 : i32
    %c0_i32_0 = arith.constant 0 : i32
    %c0_i32_1 = arith.constant 0 : i32
    return %c0_i32, %c0_i32_0 : i32, i32
  }
  func.func @transform_6(%arg0: i32, %arg1: i32) -> (i32, i32) {
    %c0_i32 = arith.constant 0 : i32
    %c0_i32_0 = arith.constant 0 : i32
    %c0_i32_1 = arith.constant 0 : i32
    return %c0_i32, %c0_i32_0 : i32, i32
  }
  func.func @transform_7(%arg0: i32, %arg1: i32) -> (i32, i32, i32) {
    %c0_i32 = arith.constant 0 : i32
    %c0_i32_0 = arith.constant 0 : i32
    return %arg0, %c0_i32, %arg1 : i32, i32, i32
  }
}

</mosaic_0001>

<bundles_post_ra>
// kernel: bn_add_conv1x1.1
= control target key start
LH: loop header
LB: loop body
LE: loop exit
PB: predicated region body
PF: predicated region fallthrough
CT: control target
= control target key end

     0   :  { %s1078_s24 = smov 0   ;;  %s1080_s25 = smov 0   ;;  %s1350_s0 = inlined_call_operand.vmem [shape: f32[2,32,256], index: 0, kind: input, shape index: {}]   ;;  %s1351_s1 = inlined_call_operand.vmem [shape: f32[2,32,256], index: 1, kind: input, shape index: {}]   ;;  %s1352_s2 = inlined_call_operand.vmem [shape: f32[32,1], index: 2, kind: input, shape index: {}]   ;;  %s1353_s3 = inlined_call_operand.vmem [shape: f32[32,1], index: 3, kind: input, shape index: {}]   ;;  %s1354_s4 = inlined_call_operand.vmem [shape: f32[32,1], index: 4, kind: input, shape index: {}]   ;;  %s1355_s5 = inlined_call_operand.vmem [shape: f32[32,1], index: 5, kind: input, shape index: {}]   ;;  %s1356_s6 = inlined_call_operand.vmem [shape: f32[192,32], index: 6, kind: input, shape index: {}]   ;;  %s1357_s7 = inlined_call_operand.vmem [shape: f32[2,192,256], index: 7, kind: output, shape index: {}]  }
   0x1   :  { %s1082_s26 = smov 0  }
   0x2 LB: > { %s29_s27 = sadd.s32 1, %s1030_s25  ;;  %p933_p0 = scmp.ge.s32.totalorder %s1034_s26, 1  ;;  %s1034_s26 = sphi %s1082_s26, %s17_s26   ;;  %s1030_s25 = sphi %s1080_s25, %s1359_s25   ;;  %s1026_s24 = sphi %s1078_s24, %s1358_s24  }
   0x3   : > { %p31_p1 = scmp.ge.s32.totalorder %s29_s27, 2  ;;  %p275_p2 = scmp.lt.s32.totalorder %s1034_s26, 3 }
   0x5   : > { %s1361_s27 = smov (%p31_p1, %s29_s27), 0  ;;  %p276_p3 = pnand %p933_p0, %p275_p2 }
   0x6   : > { %p325_p4 = scmp.lt.s32.totalorder (!%p276_p3), %s1026_s24, 1 }
   0x7   : > { %279 = sbr.rel (%p276_p3) target bundleno = 415 (0x19f), region = 48 }
   0xc   : > { %v361_v0 = vld [vmem:[%s1355_s5 + $0x18] sm:$0xff]  ;;  %v1036_v1 = vmov 0   ;;  %v359_v3 = vld [vmem:[%s1355_s5 + $0x8] sm:$0xff]  ;;  %v360_v5 = vld [vmem:[%s1355_s5 + $0x10] sm:$0xff]  ;;  %v1037_v37 = vmov 0.0   ;;  %s1363_s24 = smov (!%p325_p4, %s1026_s24), 1 }
   0xd   : > { %1003 = vset.pattern.permute.xlu1 %v1036_v1  ;;  %1002 = vset.pattern.permute.xlu0 %v1036_v1  ;;  %v365_v2 = vadd.f32 1e-05, %v361_v0  ;;  %v363_v4 = vadd.f32 1e-05, %v359_v3  ;;  %v364_v6 = vadd.f32 1e-05, %v360_v5 }
   0xe   : > { %v358_v7 = vld [vmem:[%s1355_s5] sm:$0xff]  ;;  %v357_v9 = vld [vmem:[%s1352_s2 + $0x18] sm:$0xff]  ;;  %v355_v10 = vld [vmem:[%s1352_s2 + $0x8] sm:$0xff]  ;;  %631 = vmatprep.mubr.f32.mxu0 %v1037_v37  ;;  %703 = vmatprep.mubr.f32.mxu1 %v1037_v37  ;;  %s965_s18 = sshll.u32 %s1363_s24, 6  ;;  %vm494_vm0 = vcmask 261120   ;;  %s975_s16 = smul.u32 384, %s1363_s24 }
   0xf   : > { %1004 = vrsqrt.f32 %v365_v2  ;;  %v362_v8 = vadd.f32 1e-05, %v358_v7  ;;  %v381_v12 = vld [vmem:[%s1354_s4 + $0x18] sm:$0xff]  ;;  %v356_v13 = vld [vmem:[%s1352_s2 + $0x10] sm:$0xff]  ;;  %v354_v20 = vld [vmem:[%s1352_s2] sm:$0xff]  ;;  %s332_s21 = scalar_lea.vmem %s1350_s0, %s965_s18  ;;  %s1159_s28 = scalar_lea.vmem %s1351_s1, %s965_s18 }
  0x10   : > { %1006 = vrsqrt.f32 %v363_v4  ;;  %v377_v18 = vld [vmem:[%s1353_s3 + $0x18] sm:$0xff]  ;;  %v380_v19 = vld [vmem:[%s1354_s4 + $0x10] sm:$0xff]  ;;  %v379_v24 = vld [vmem:[%s1354_s4 + $0x8] sm:$0xff]  ;;  %s1291_s19 = scalar_lea.vmem %s1357_s7, %s975_s16 }
  0x11   : > { %1008 = vrsqrt.f32 %v364_v6  ;;  %v376_v25 = vld [vmem:[%s1353_s3 + $0x10] sm:$0xff]  ;;  %v378_v29 = vld [vmem:[%s1354_s4] sm:$0xff]  ;;  %v375_v32 = vld [vmem:[%s1353_s3 + $0x8] sm:$0xff] }
  0x12   : > { %1010 = vrsqrt.f32 %v362_v8  ;;  %v374_v34 = vld [vmem:[%s1353_s3] sm:$0xff]  ;;  %v396_v39 = vld [vmem:[%s332_s21 + $0x30] sm:$0xff]  ;;  %v397_v40 = vld [vmem:[%s332_s21 + $0x38] sm:$0xff] }
  0x13   : > { %v394_v45 = vld [vmem:[%s332_s21 + $0x20] sm:$0xff]  ;;  %v395_v46 = vld [vmem:[%s332_s21 + $0x28] sm:$0xff]  ;;  %v461_v48 = vld [vmem:[%s1159_s28 + $0x38] sm:$0xff] }
  0x14   : > { %v460_v49 = vld [vmem:[%s1159_s28 + $0x30] sm:$0xff]  ;;  %v393_v55 = vld [vmem:[%s332_s21 + $0x18] sm:$0xff]  ;;  %v458_v57 = vld [vmem:[%s1159_s28 + $0x20] sm:$0xff] }
  0x15   : > { %v392_v52 = vld [vmem:[%s332_s21 + $0x10] sm:$0xff]  ;;  %v459_v58 = vld [vmem:[%s1159_s28 + $0x28] sm:$0xff]  ;;  %v390_v0 = vld [vmem:[%s332_s21] sm:$0xff] }
  0x16   : > { %v391_v1 = vld [vmem:[%s332_s21 + $0x8] sm:$0xff] }
  0x1c   : > { %v1005_v11 = vpop.eup %1004 }
  0x1d   : > { %v1007_v14 = vpop.eup %1006  ;;  %v373_v15 = vmul.f32 %v1005_v11, %v357_v9  ;;  %v456_v9 = vld [vmem:[%s1159_s28 + $0x10] sm:$0xff] }
  0x1e   : > { %v1009_v16 = vpop.eup %1008  ;;  %v371_v17 = vmul.f32 %v1007_v14, %v355_v10  ;;  %v457_v10 = vld [vmem:[%s1159_s28 + $0x18] sm:$0xff] }
  0x1f   : > { %415 = vperm.xlu0 %1002, %v373_v15   ;;  %v385_v21 = vmul.f32 %v381_v12, %v373_v15  ;;  %v372_v22 = vmul.f32 %v1009_v16, %v356_v13  ;;  %v1011_v23 = vpop.eup %1010  ;;  %v455_v16 = vld [vmem:[%s1159_s28 + $0x8] sm:$0xff] }
  0x20   : > { %405 = vperm.xlu1 %1003, %v371_v17   ;;  %v370_v28 = vmul.f32 %v1011_v23, %v354_v20  ;;  %v383_v30 = vmul.f32 %v379_v24, %v371_v17  ;;  %v482_v23 = vld [vmem:[%s1356_s6 + $0x60] sm:$0xff]  ;;  %v471_v24 = vld [vmem:[%s1356_s6 + $0x8] sm:$0xff] }
  0x21   : > { %v389_v26 = vsub.f32 %v377_v18, %v385_v21  ;;  %v384_v27 = vmul.f32 %v380_v19, %v372_v22  ;;  %v454_v19 = vld [vmem:[%s1159_s28] sm:$0xff] }
  0x22   : > { %v382_v33 = vmul.f32 %v378_v29, %v370_v28  ;;  %v387_v35 = vsub.f32 %v375_v32, %v383_v30  ;;  %v485_v29 = vld [vmem:[%s1356_s6 + $0x78] sm:$0xff]  ;;  %v474_v30 = vld [vmem:[%s1356_s6 + $0x20] sm:$0xff]  ;;  %v475_v32 = vld [vmem:[%s1356_s6 + $0x28] sm:$0xff] }
  0x23   : > { %410 = vperm.xlu0 %1002, %v372_v22   ;;  %v388_v31 = vsub.f32 %v376_v25, %v384_v27  ;;  %v470_v22 = vld [vmem:[%s1356_s6] sm:$0xff]  ;;  %v483_v25 = vld [vmem:[%s1356_s6 + $0x68] sm:$0xff]  ;;  %v484_v27 = vld [vmem:[%s1356_s6 + $0x70] sm:$0xff] }
  0x24   : > { %443 = vperm.xlu1 %1003, %v389_v26   ;;  %v386_v36 = vsub.f32 %v374_v34, %v382_v33  ;;  %v472_v26 = vld [vmem:[%s1356_s6 + $0x10] sm:$0xff]  ;;  %v487_v33 = vld [vmem:[%s1356_s6 + $0x88] sm:$0xff] }
  0x25   : > { %v476_v34 = vld [vmem:[%s1356_s6 + $0x30] sm:$0xff] }
  0x27   : > { %438 = vperm.xlu0 %1002, %v388_v31   ;;  %v486_v31 = vld [vmem:[%s1356_s6 + $0x80] sm:$0xff] }
  0x28   : > { %400 = vperm.xlu1 %1003, %v370_v28   ;;  %v473_v28 = vld [vmem:[%s1356_s6 + $0x18] sm:$0xff] }
  0x2b   : > { %433 = vperm.xlu0 %1002, %v387_v35   ;;  %v488_v35 = vld [vmem:[%s1356_s6 + $0x90] sm:$0xff] }
  0x2c   : > { %428 = vperm.xlu1 %1003, %v386_v36   ;;  %v477_v36 = vld [vmem:[%s1356_s6 + $0x38] sm:$0xff] }
  0x9a   : > { %v416_v38 = vpop.permute.xlu0 %415 }
  0x9b   : > { %v406_v41 = vpop.permute.xlu1 %405  ;;  %v424_v42 = vmul.f32 %v416_v38, %v396_v39  ;;  %v425_v43 = vmul.f32 %v416_v38, %v397_v40  ;;  %v489_v38 = vld [vmem:[%s1356_s6 + $0x98] sm:$0xff]  ;;  %v478_v39 = vld [vmem:[%s1356_s6 + $0x40] sm:$0xff] }
  0x9c   : > { %v420_v2 = vmul.f32 %v406_v41, %v392_v52  ;;  %v421_v3 = vmul.f32 %v406_v41, %v393_v55  ;;  %v490_v40 = vld [vmem:[%s1356_s6 + $0xa0] sm:$0xff]  ;;  %v479_v41 = vld [vmem:[%s1356_s6 + $0x48] sm:$0xff] }
  0x9e   : > { %v411_v44 = vpop.permute.xlu0 %410 }
  0x9f   : > { %v444_v47 = vpop.permute.xlu1 %443  ;;  %v422_v53 = vmul.f32 %v411_v44, %v394_v45  ;;  %v423_v54 = vmul.f32 %v411_v44, %v395_v46  ;;  %v492_v44 = vld [vmem:[%s1356_s6 + $0xb0] sm:$0xff]  ;;  %v481_v45 = vld [vmem:[%s1356_s6 + $0x58] sm:$0xff] }
  0xa0   : > { %v452_v50 = vadd.f32 %v444_v47, %v424_v42  ;;  %v453_v51 = vadd.f32 %v444_v47, %v425_v43  ;;  %v491_v42 = vld [vmem:[%s1356_s6 + $0xa8] sm:$0xff]  ;;  %v480_v43 = vld [vmem:[%s1356_s6 + $0x50] sm:$0xff]  ;;  %v493_v46 = vld [vmem:[%s1356_s6 + $0xb8] sm:$0xff] }
  0xa2   : > { %v439_v56 = vpop.permute.xlu0 %438  ;;  %v469_v59 = vadd.f32 %v461_v48, %v453_v51  ;;  %v468_v60 = vadd.f32 %v460_v49, %v452_v50 }
  0xa3   : > { %v450_v61 = vadd.f32 %v439_v56, %v422_v53  ;;  %v451_v62 = vadd.f32 %v439_v56, %v423_v54  ;;  %v401_v63 = vpop.permute.xlu1 %400 }
  0xa4   : > { %591 = vmatprep.subr.mxu0 %v469_v59  ;;  %967 = vmatprep.subr.mxu1 %v469_v59  ;;  %v418_v6 = vmul.f32 %v401_v63, %v390_v0  ;;  %v419_v7 = vmul.f32 %v401_v63, %v391_v1 }
  0xa5   : > { %v466_v4 = vadd.f32 %v458_v57, %v450_v61  ;;  %v467_v5 = vadd.f32 %v459_v58, %v451_v62  ;;  %592 = vmatpush1.msra.mxu0 %v468_v60  ;;  %971 = vmatpush1.msra.mxu1 %v468_v60 }
  0xa6   : > { %v434_v8 = vpop.permute.xlu0 %433 }
  0xa7   : > { %v448_v11 = vadd.f32 %v434_v8, %v420_v2  ;;  %v449_v12 = vadd.f32 %v434_v8, %v421_v3  ;;  %v429_v13 = vpop.permute.xlu1 %428  ;;  %593 = vmatprep.subr.mxu0 %v467_v5  ;;  %968 = vmatprep.subr.mxu1 %v467_v5 }
  0xa8   : > { %v446_v14 = vadd.f32 %v429_v13, %v418_v6  ;;  %v447_v15 = vadd.f32 %v429_v13, %v419_v7  ;;  %594 = vmatpush1.msra.mxu0 %v466_v4  ;;  %972 = vmatpush1.msra.mxu1 %v466_v4 }
  0xa9   : > { %v464_v17 = vadd.f32 %v456_v9, %v448_v11  ;;  %v465_v18 = vadd.f32 %v457_v10, %v449_v12 }
  0xaa   : > { %v463_v20 = vadd.f32 %v455_v16, %v447_v15  ;;  %v462_v21 = vadd.f32 %v454_v19, %v446_v14 }
  0xab   : > { %595 = vmatprep.subr.mxu0 %v465_v18  ;;  %969 = vmatprep.subr.mxu1 %v465_v18 }
  0xac   : > { %596 = vmatpush1.msra.mxu0 %v464_v17  ;;  %973 = vmatpush1.msra.mxu1 %v464_v17 }
  0xad   : > { %597 = vmatprep.subr.mxu0 %v463_v20  ;;  %970 = vmatprep.subr.mxu1 %v463_v20 }
  0xae   : > { %598 = vmatpush1.msra.mxu0 %v462_v21  ;;  %974 = vmatpush1.msra.mxu1 %v462_v21 }
  0xaf   : > { %939 = vmatmul.mubr.msk.f32.vlgmr.msra.gmra.mxu0 %vm494_vm0, %v470_v22  ;;  %951 = vmatmul.mubr.msk.f32.vlgmr.msra.gmra.mxu1 %vm494_vm0, %v482_v23 }
  0xb0   : > { %637 = vmatprep.mubr.f32.mxu0 %v1037_v37  ;;  %709 = vmatprep.mubr.f32.mxu1 %v1037_v37 }
  0xb3   : > { %940 = vmatmul.mubr.msk.f32.gmra.mxu0 %vm494_vm0, %v471_v24  ;;  %952 = vmatmul.mubr.msk.f32.gmra.mxu1 %vm494_vm0, %v483_v25 }
  0xb4   : > { %643 = vmatprep.mubr.f32.mxu0 %v1037_v37  ;;  %715 = vmatprep.mubr.f32.mxu1 %v1037_v37 }
  0xb7   : > { %941 = vmatmul.mubr.msk.f32.gmra.mxu0 %vm494_vm0, %v472_v26  ;;  %953 = vmatmul.mubr.msk.f32.gmra.mxu1 %vm494_vm0, %v484_v27 }
  0xb8   : > { %649 = vmatprep.mubr.f32.mxu0 %v1037_v37  ;;  %721 = vmatprep.mubr.f32.mxu1 %v1037_v37 }
  0xbb   : > { %942 = vmatmul.mubr.msk.f32.gmra.mxu0 %vm494_vm0, %v473_v28  ;;  %954 = vmatmul.mubr.msk.f32.gmra.mxu1 %vm494_vm0, %v485_v29 }
  0xbc   : > { %655 = vmatprep.mubr.f32.mxu0 %v1037_v37  ;;  %727 = vmatprep.mubr.f32.mxu1 %v1037_v37 }
  0xbf   : > { %943 = vmatmul.mubr.msk.f32.gmra.mxu0 %vm494_vm0, %v474_v30  ;;  %955 = vmatmul.mubr.msk.f32.gmra.mxu1 %vm494_vm0, %v486_v31 }
  0xc0   : > { %661 = vmatprep.mubr.f32.mxu0 %v1037_v37  ;;  %733 = vmatprep.mubr.f32.mxu1 %v1037_v37 }
  0xc3   : > { %944 = vmatmul.mubr.msk.f32.gmra.mxu0 %vm494_vm0, %v475_v32  ;;  %956 = vmatmul.mubr.msk.f32.gmra.mxu1 %vm494_vm0, %v487_v33 }
  0xc4   : > { %667 = vmatprep.mubr.f32.mxu0 %v1037_v37  ;;  %739 = vmatprep.mubr.f32.mxu1 %v1037_v37 }
  0xc7   : > { %945 = vmatmul.mubr.msk.f32.gmra.mxu0 %vm494_vm0, %v476_v34  ;;  %957 = vmatmul.mubr.msk.f32.gmra.mxu1 %vm494_vm0, %v488_v35 }
  0xc8   : > { %673 = vmatprep.mubr.f32.mxu0 %v1037_v37  ;;  %745 = vmatprep.mubr.f32.mxu1 %v1037_v37 }
  0xcb   : > { %946 = vmatmul.mubr.msk.f32.gmra.mxu0 %vm494_vm0, %v477_v36  ;;  %958 = vmatmul.mubr.msk.f32.gmra.mxu1 %vm494_vm0, %v489_v38 }
  0xcc   : > { %679 = vmatprep.mubr.f32.mxu0 %v1037_v37  ;;  %751 = vmatprep.mubr.f32.mxu1 %v1037_v37 }
  0xcf   : > { %947 = vmatmul.mubr.msk.f32.gmra.mxu0 %vm494_vm0, %v478_v39  ;;  %959 = vmatmul.mubr.msk.f32.gmra.mxu1 %vm494_vm0, %v490_v40 }
  0xd0   : > { %685 = vmatprep.mubr.f32.mxu0 %v1037_v37  ;;  %757 = vmatprep.mubr.f32.mxu1 %v1037_v37 }
  0xd3   : > { %948 = vmatmul.mubr.msk.f32.gmra.mxu0 %vm494_vm0, %v479_v41  ;;  %960 = vmatmul.mubr.msk.f32.gmra.mxu1 %vm494_vm0, %v491_v42 }
  0xd4   : > { %691 = vmatprep.mubr.f32.mxu0 %v1037_v37  ;;  %763 = vmatprep.mubr.f32.mxu1 %v1037_v37 }
  0xd7   : > { %949 = vmatmul.mubr.msk.f32.gmra.mxu0 %vm494_vm0, %v480_v43  ;;  %961 = vmatmul.mubr.msk.f32.gmra.mxu1 %vm494_vm0, %v492_v44 }
  0xd8   : > { %697 = vmatprep.mubr.f32.mxu0 %v1037_v37  ;;  %769 = vmatprep.mubr.f32.mxu1 %v1037_v37 }
  0xdb   : > { %950 = vmatmul.mubr.msk.f32.gmra.mxu0 %vm494_vm0, %v481_v45  ;;  %962 = vmatmul.mubr.msk.f32.gmra.mxu1 %vm494_vm0, %v493_v46 }
 0x16f   : > { %v633_v37 = vpop.f32.mrf.mxu0  ;;  %v705_v47 = vpop.f32.mrf.mxu1 }
 0x170   : > { %776 = vst [vmem:[%s1291_s19] sm:$0xff] %v633_v37  ;;  %800 = vst [vmem:[%s1291_s19 + $0xc0] sm:$0xff] %v705_v47 }
 0x171   : > { %v635_v48 = vpop.f32.mrf.mxu0  ;;  %v707_v49 = vpop.f32.mrf.mxu1 }
 0x172   : > { %777 = vst [vmem:[%s1291_s19 + $0x8] sm:$0xff] %v635_v48  ;;  %801 = vst [vmem:[%s1291_s19 + $0xc8] sm:$0xff] %v707_v49 }
 0x173   : > { %v639_v50 = vpop.f32.mrf.mxu0  ;;  %v711_v51 = vpop.f32.mrf.mxu1 }
 0x174   : > { %778 = vst [vmem:[%s1291_s19 + $0x10] sm:$0xff] %v639_v50  ;;  %802 = vst [vmem:[%s1291_s19 + $0xd0] sm:$0xff] %v711_v51 }
 0x175   : > { %v641_v52 = vpop.f32.mrf.mxu0  ;;  %v713_v53 = vpop.f32.mrf.mxu1 }
 0x176   : > { %779 = vst [vmem:[%s1291_s19 + $0x18] sm:$0xff] %v641_v52  ;;  %803 = vst [vmem:[%s1291_s19 + $0xd8] sm:$0xff] %v713_v53 }
 0x177   : > { %v645_v54 = vpop.f32.mrf.mxu0  ;;  %v717_v55 = vpop.f32.mrf.mxu1 }
 0x178   : > { %780 = vst [vmem:[%s1291_s19 + $0x20] sm:$0xff] %v645_v54  ;;  %804 = vst [vmem:[%s1291_s19 + $0xe0] sm:$0xff] %v717_v55 }
 0x179   : > { %v647_v56 = vpop.f32.mrf.mxu0  ;;  %v719_v57 = vpop.f32.mrf.mxu1 }
 0x17a   : > { %781 = vst [vmem:[%s1291_s19 + $0x28] sm:$0xff] %v647_v56  ;;  %805 = vst [vmem:[%s1291_s19 + $0xe8] sm:$0xff] %v719_v57 }
 0x17b   : > { %v651_v58 = vpop.f32.mrf.mxu0  ;;  %v723_v59 = vpop.f32.mrf.mxu1 }
 0x17c   : > { %782 = vst [vmem:[%s1291_s19 + $0x30] sm:$0xff] %v651_v58  ;;  %806 = vst [vmem:[%s1291_s19 + $0xf0] sm:$0xff] %v723_v59 }
 0x17d   : > { %v653_v60 = vpop.f32.mrf.mxu0  ;;  %v725_v61 = vpop.f32.mrf.mxu1 }
 0x17e   : > { %783 = vst [vmem:[%s1291_s19 + $0x38] sm:$0xff] %v653_v60  ;;  %807 = vst [vmem:[%s1291_s19 + $0xf8] sm:$0xff] %v725_v61 }
 0x17f   : > { %v657_v62 = vpop.f32.mrf.mxu0  ;;  %v729_v63 = vpop.f32.mrf.mxu1 }
 0x180   : > { %784 = vst [vmem:[%s1291_s19 + $0x40] sm:$0xff] %v657_v62  ;;  %808 = vst [vmem:[%s1291_s19 + $0x100] sm:$0xff] %v729_v63 }
 0x181   : > { %v659_v0 = vpop.f32.mrf.mxu0  ;;  %v731_v1 = vpop.f32.mrf.mxu1 }
 0x182   : > { %785 = vst [vmem:[%s1291_s19 + $0x48] sm:$0xff] %v659_v0  ;;  %809 = vst [vmem:[%s1291_s19 + $0x108] sm:$0xff] %v731_v1 }
 0x183   : > { %v663_v2 = vpop.f32.mrf.mxu0  ;;  %v735_v3 = vpop.f32.mrf.mxu1 }
 0x184   : > { %786 = vst [vmem:[%s1291_s19 + $0x50] sm:$0xff] %v663_v2  ;;  %810 = vst [vmem:[%s1291_s19 + $0x110] sm:$0xff] %v735_v3 }
 0x185   : > { %v665_v4 = vpop.f32.mrf.mxu0  ;;  %v737_v5 = vpop.f32.mrf.mxu1 }
 0x186   : > { %787 = vst [vmem:[%s1291_s19 + $0x58] sm:$0xff] %v665_v4  ;;  %811 = vst [vmem:[%s1291_s19 + $0x118] sm:$0xff] %v737_v5 }
 0x187   : > { %v669_v6 = vpop.f32.mrf.mxu0  ;;  %v741_v7 = vpop.f32.mrf.mxu1 }
 0x188   : > { %788 = vst [vmem:[%s1291_s19 + $0x60] sm:$0xff] %v669_v6  ;;  %812 = vst [vmem:[%s1291_s19 + $0x120] sm:$0xff] %v741_v7 }
 0x189   : > { %v671_v8 = vpop.f32.mrf.mxu0  ;;  %v743_v9 = vpop.f32.mrf.mxu1 }
 0x18a   : > { %789 = vst [vmem:[%s1291_s19 + $0x68] sm:$0xff] %v671_v8  ;;  %813 = vst [vmem:[%s1291_s19 + $0x128] sm:$0xff] %v743_v9 }
 0x18b   : > { %v675_v10 = vpop.f32.mrf.mxu0  ;;  %v747_v11 = vpop.f32.mrf.mxu1 }
 0x18c   : > { %790 = vst [vmem:[%s1291_s19 + $0x70] sm:$0xff] %v675_v10  ;;  %814 = vst [vmem:[%s1291_s19 + $0x130] sm:$0xff] %v747_v11 }
 0x18d   : > { %v677_v12 = vpop.f32.mrf.mxu0  ;;  %v749_v13 = vpop.f32.mrf.mxu1 }
 0x18e   : > { %791 = vst [vmem:[%s1291_s19 + $0x78] sm:$0xff] %v677_v12  ;;  %815 = vst [vmem:[%s1291_s19 + $0x138] sm:$0xff] %v749_v13 }
 0x18f   : > { %v681_v14 = vpop.f32.mrf.mxu0  ;;  %v753_v15 = vpop.f32.mrf.mxu1 }
 0x190   : > { %792 = vst [vmem:[%s1291_s19 + $0x80] sm:$0xff] %v681_v14  ;;  %816 = vst [vmem:[%s1291_s19 + $0x140] sm:$0xff] %v753_v15 }
 0x191   : > { %v683_v16 = vpop.f32.mrf.mxu0  ;;  %v755_v17 = vpop.f32.mrf.mxu1 }
 0x192   : > { %793 = vst [vmem:[%s1291_s19 + $0x88] sm:$0xff] %v683_v16  ;;  %817 = vst [vmem:[%s1291_s19 + $0x148] sm:$0xff] %v755_v17 }
 0x193   : > { %v687_v18 = vpop.f32.mrf.mxu0  ;;  %v759_v19 = vpop.f32.mrf.mxu1 }
 0x194   : > { %794 = vst [vmem:[%s1291_s19 + $0x90] sm:$0xff] %v687_v18  ;;  %818 = vst [vmem:[%s1291_s19 + $0x150] sm:$0xff] %v759_v19 }
 0x195   : > { %v689_v20 = vpop.f32.mrf.mxu0  ;;  %v761_v21 = vpop.f32.mrf.mxu1 }
 0x196   : > { %795 = vst [vmem:[%s1291_s19 + $0x98] sm:$0xff] %v689_v20  ;;  %819 = vst [vmem:[%s1291_s19 + $0x158] sm:$0xff] %v761_v21 }
 0x197   : > { %v693_v22 = vpop.f32.mrf.mxu0  ;;  %v765_v23 = vpop.f32.mrf.mxu1 }
 0x198   : > { %796 = vst [vmem:[%s1291_s19 + $0xa0] sm:$0xff] %v693_v22  ;;  %820 = vst [vmem:[%s1291_s19 + $0x160] sm:$0xff] %v765_v23 }
 0x199   : > { %v695_v24 = vpop.f32.mrf.mxu0  ;;  %v767_v25 = vpop.f32.mrf.mxu1 }
 0x19a   : > { %797 = vst [vmem:[%s1291_s19 + $0xa8] sm:$0xff] %v695_v24  ;;  %821 = vst [vmem:[%s1291_s19 + $0x168] sm:$0xff] %v767_v25 }
 0x19b   : > { %v699_v26 = vpop.f32.mrf.mxu0  ;;  %v771_v27 = vpop.f32.mrf.mxu1 }
 0x19c   : > { %798 = vst [vmem:[%s1291_s19 + $0xb0] sm:$0xff] %v699_v26  ;;  %822 = vst [vmem:[%s1291_s19 + $0x170] sm:$0xff] %v771_v27 }
 0x19d   : > { %v701_v28 = vpop.f32.mrf.mxu0  ;;  %v773_v29 = vpop.f32.mrf.mxu1 }
 0x19e   : > { %799 = vst [vmem:[%s1291_s19 + $0xb8] sm:$0xff] %v701_v28  ;;  %823 = vst [vmem:[%s1291_s19 + $0x178] sm:$0xff] %v773_v29 }
 0x19f PF: > { %s17_s26 = sadd.s32 1, %s1034_s26   ;;  %s1358_s24 = smov %s1030_s25 }
 0x1a0   : > { %p14_p5 = scmp.ge.s32.totalorder %s17_s26, 4   ;;  %s1359_s25 = smov %s1361_s27 }
 0x1a2   :  { %16 = sbr.rel (!%p14_p5) target bundleno = 2 (0x2), region = 81 }

</bundles_post_ra>
